<compile_context>
chip_gen: v6e
topology: v6e:2x2x1
jax: 0.10.0
libtpu: 0.0.40
codegen_flags: <defaults>
</compile_context>

<pallas_src>
import jax
import jax.numpy as jnp
from jax.experimental import pallas as pl
from jax.experimental.pallas import tpu as pltpu


def _round_up(x, m):
    return ((x + m - 1) // m) * m


# ----------------------------- Pallas kernel ------------------------------ #
def _hotcold3_kernel(x_ref, w1_ref, b1_ref, w2_ref, b2_ref, w3_ref, b3_ref,
                     o_ref):
    """Fused HotCold3 forward for one tile of batch rows.

    All operands are lane-padded (last dim multiple of 128) so every dot and
    store is on aligned, unmasked tiles. Accumulation is f32 on the MXU;
    sigmoids run on the EUP (exp) + VPU.
    """
    h = jnp.dot(x_ref[...], w1_ref[...], preferred_element_type=jnp.float32)
    h = 1.0 / (1.0 + jnp.exp(-(h + b1_ref[...])))          # sigmoid(fc1)
    h = jnp.dot(h, w2_ref[...], preferred_element_type=jnp.float32)
    h = 1.0 / (1.0 + jnp.exp(-(h + b2_ref[...])))          # sigmoid(fc2)
    y = jnp.dot(h, w3_ref[...], preferred_element_type=jnp.float32)
    o_ref[...] = (y + b3_ref[...]).astype(o_ref.dtype)     # fc3 (no activation)


# ------------------------------- wrapper ----------------------------------- #
def hotcold3_forward(x, padded_params, *, tm_max=256):
    """y = fc3(sigmoid(fc2(sigmoid(fc1(x))))) via one fused Pallas kernel.

    x: (B, in_channels) f32.
    padded_params: lane-padded (w1, b1, w2, b2, w3, b3) from pad_params_for_tpu.
    Returns (B, 1) f32.
    """
    w1p, b1p, w2p, b2p, w3p, b3p = padded_params
    B, d_in = x.shape
    Kp, H1p = w1p.shape
    H2p = w2p.shape[1]
    Np = w3p.shape[1]
    assert d_in <= Kp

    # Row tile: only round the batch up to the 8-sublane minimum (or tm_max for
    # large batches) — no 128-row padding waste on tiny batches.
    tm = min(tm_max, _round_up(B, 8))
    m_pad = _round_up(B, tm)
    x_p = jnp.zeros((m_pad, Kp), jnp.float32).at[:B, :d_in].set(x)

    out = pl.pallas_call(
        _hotcold3_kernel,
        out_shape=jax.ShapeDtypeStruct((m_pad, Np), jnp.float32),
        grid_spec=pltpu.PrefetchScalarGridSpec(
            num_scalar_prefetch=0,
            grid=(m_pad // tm,),
            in_specs=[
                pl.BlockSpec((tm, Kp), lambda i: (i, 0)),    # x tile
                pl.BlockSpec((Kp, H1p), lambda i: (0, 0)),   # w1 (resident)
                pl.BlockSpec((1, H1p), lambda i: (0, 0)),    # b1
                pl.BlockSpec((H1p, H2p), lambda i: (0, 0)),  # w2
                pl.BlockSpec((1, H2p), lambda i: (0, 0)),    # b2
                pl.BlockSpec((H2p, Np), lambda i: (0, 0)),   # w3
                pl.BlockSpec((1, Np), lambda i: (0, 0)),     # b3
            ],
            out_specs=pl.BlockSpec((tm, Np), lambda i: (i, 0)),
        ),
        compiler_params=pltpu.CompilerParams(
            dimension_semantics=("parallel",),
        ),
    )(x_p, w1p, b1p, w2p, b2p, w3p, b3p)

    # Drop padded batch rows and padded (all-zero) output lanes.
    return out[:B, :1]


# ---------------------------- params / padding ----------------------------- #
def init_params(key, in_channels=2, num_hidden1=100, num_hidden2=25):
    """PyTorch-style nn.Linear init: U(-1/sqrt(fan_in), +1/sqrt(fan_in)).

    Weights are stored as (in_features, out_features) == torch weight.T so the
    forward is a plain x @ w + b.
    """
    def uni(k, shape, fan_in):
        bound = 1.0 / jnp.sqrt(jnp.float32(fan_in))
        return jax.random.uniform(k, shape, jnp.float32, -bound, bound)

    ks = jax.random.split(key, 6)
    return {
        "w1": uni(ks[0], (in_channels, num_hidden1), in_channels),
        "b1": uni(ks[1], (num_hidden1,), in_channels),
        "w2": uni(ks[2], (num_hidden1, num_hidden2), num_hidden1),
        "b2": uni(ks[3], (num_hidden2,), num_hidden1),
        "w3": uni(ks[4], (num_hidden2, 1), num_hidden2),
        "b3": uni(ks[5], (1,), num_hidden2),
    }


def pad_params_for_tpu(p, lane=128):
    """Zero-pad every feature dim to a multiple of 128 lanes (done once).

    Zero padding is exact for this network: padded hidden lanes come out of the
    sigmoid as 0.5 but are multiplied by zero weight rows downstream, and the
    padded output lanes are identically zero and sliced off by the wrapper.
    """
    def pad_w(w):
        K, N = w.shape
        out = jnp.zeros((_round_up(K, lane), _round_up(N, lane)), jnp.float32)
        return out.at[:K, :N].set(w)

    def pad_b(b):
        N = b.shape[0]
        out = jnp.zeros((1, _round_up(N, lane)), jnp.float32)
        return out.at[0, :N].set(b)

    return (pad_w(p["w1"]), pad_b(p["b1"]),
            pad_w(p["w2"]), pad_b(p["b2"]),
            pad_w(p["w3"]), pad_b(p["b3"]))


def reference_forward(x, p):
    """Pure-JAX reference matching the PyTorch HotCold3.forward."""
    h = jax.nn.sigmoid(x @ p["w1"] + p["b1"])
    h = jax.nn.sigmoid(h @ p["w2"] + p["b2"])
    return h @ p["w3"] + p["b3"]


# ---------------------------------- main ----------------------------------- #
if __name__ == "__main__":
    B, in_channels = 2, 2          # HotCold3 default in_channels=2
    num_hidden1, num_hidden2 = 100, 25

    key = jax.random.PRNGKey(0)
    kx, kp = jax.random.split(key)
    params = init_params(kp, in_channels, num_hidden1, num_hidden2)
    padded = pad_params_for_tpu(params)
    x = jax.random.normal(kx, (B, in_channels), jnp.float32)

    fwd = jax.jit(lambda xx: hotcold3_forward(xx, padded))
    out = fwd(x)
    jax.block_until_ready(out)
    assert out.shape == (B, 1) and out.dtype == jnp.float32

    ref = reference_forward(x, params)
    assert jnp.allclose(out, ref, atol=1e-5, rtol=1e-5)
    print("KERNEL_OK")
</pallas_src>

<mosaic_0001>
module attributes {stable_mosaic.version = 11 : i64} {
  func.func @_hotcold3_kernel(%arg0: i32, %arg1: memref<8x128xf32, #tpu.memory_space<vmem>>, %arg2: memref<128x128xf32, #tpu.memory_space<vmem>>, %arg3: memref<1x128xf32, #tpu.memory_space<vmem>>, %arg4: memref<128x128xf32, #tpu.memory_space<vmem>>, %arg5: memref<1x128xf32, #tpu.memory_space<vmem>>, %arg6: memref<128x128xf32, #tpu.memory_space<vmem>>, %arg7: memref<1x128xf32, #tpu.memory_space<vmem>>, %arg8: memref<8x128xf32, #tpu.memory_space<vmem>>) attributes {dimension_semantics = [#tpu.dimension_semantics<parallel>], iteration_bounds = array<i64: 1>, scalar_prefetch = 0 : i64, scratch_operands = 0 : i64, tpu.core_type = #tpu.core_type<tc>, window_params = [{transform_indices = @transform_0, window_bounds = array<i64: 8, 128>}, {pipeline_mode = #tpu.pipeline_mode<synchronous>, transform_indices = @transform_1, window_bounds = array<i64: 128, 128>}, {pipeline_mode = #tpu.pipeline_mode<synchronous>, transform_indices = @transform_2, window_bounds = array<i64: 1, 128>}, {pipeline_mode = #tpu.pipeline_mode<synchronous>, transform_indices = @transform_3, window_bounds = array<i64: 128, 128>}, {pipeline_mode = #tpu.pipeline_mode<synchronous>, transform_indices = @transform_4, window_bounds = array<i64: 1, 128>}, {pipeline_mode = #tpu.pipeline_mode<synchronous>, transform_indices = @transform_5, window_bounds = array<i64: 128, 128>}, {pipeline_mode = #tpu.pipeline_mode<synchronous>, transform_indices = @transform_6, window_bounds = array<i64: 1, 128>}, {transform_indices = @transform_7, window_bounds = array<i64: 8, 128>}]} {
    %c0 = arith.constant 0 : index
    %c0_0 = arith.constant 0 : index
    %0 = vector.load %arg1[%c0, %c0_0] : memref<8x128xf32, #tpu.memory_space<vmem>>, vector<8x128xf32>
    %c0_1 = arith.constant 0 : index
    %c0_2 = arith.constant 0 : index
    %1 = vector.load %arg2[%c0_1, %c0_2] : memref<128x128xf32, #tpu.memory_space<vmem>>, vector<128x128xf32>
    %cst = arith.constant dense<0.000000e+00> : vector<8x128xf32>
    %2 = tpu.matmul %0, %1, %cst {dimension_numbers = #tpu.dot_dimension_numbers<[1], [0], [0], [1], [0, 0, 1, 1], [], []>} : vector<8x128xf32>, vector<128x128xf32>, vector<8x128xf32> -> vector<8x128xf32>
    %c0_3 = arith.constant 0 : index
    %c0_4 = arith.constant 0 : index
    %3 = vector.load %arg3[%c0_3, %c0_4] : memref<1x128xf32, #tpu.memory_space<vmem>>, vector<1x128xf32>
    %4 = vector.broadcast %3 : vector<1x128xf32> to vector<8x128xf32>
    %5 = arith.addf %2, %4 : vector<8x128xf32>
    %cst_5 = arith.constant 0.000000e+00 : f32
    %6 = vector.broadcast %cst_5 : f32 to vector<8x128xf32>
    %7 = arith.subf %6, %5 : vector<8x128xf32>
    %8 = math.exp %7 : vector<8x128xf32>
    %cst_6 = arith.constant 1.000000e+00 : f32
    %9 = vector.broadcast %cst_6 : f32 to vector<8x128xf32>
    %10 = arith.addf %9, %8 : vector<8x128xf32>
    %cst_7 = arith.constant 1.000000e+00 : f32
    %11 = vector.broadcast %cst_7 : f32 to vector<8x128xf32>
    %12 = arith.divf %11, %10 : vector<8x128xf32>
    %c0_8 = arith.constant 0 : index
    %c0_9 = arith.constant 0 : index
    %13 = vector.load %arg4[%c0_8, %c0_9] : memref<128x128xf32, #tpu.memory_space<vmem>>, vector<128x128xf32>
    %cst_10 = arith.constant dense<0.000000e+00> : vector<8x128xf32>
    %14 = tpu.matmul %12, %13, %cst_10 {dimension_numbers = #tpu.dot_dimension_numbers<[1], [0], [0], [1], [0, 0, 1, 1], [], []>} : vector<8x128xf32>, vector<128x128xf32>, vector<8x128xf32> -> vector<8x128xf32>
    %c0_11 = arith.constant 0 : index
    %c0_12 = arith.constant 0 : index
    %15 = vector.load %arg5[%c0_11, %c0_12] : memref<1x128xf32, #tpu.memory_space<vmem>>, vector<1x128xf32>
    %16 = vector.broadcast %15 : vector<1x128xf32> to vector<8x128xf32>
    %17 = arith.addf %14, %16 : vector<8x128xf32>
    %cst_13 = arith.constant 0.000000e+00 : f32
    %18 = vector.broadcast %cst_13 : f32 to vector<8x128xf32>
    %19 = arith.subf %18, %17 : vector<8x128xf32>
    %20 = math.exp %19 : vector<8x128xf32>
    %cst_14 = arith.constant 1.000000e+00 : f32
    %21 = vector.broadcast %cst_14 : f32 to vector<8x128xf32>
    %22 = arith.addf %21, %20 : vector<8x128xf32>
    %cst_15 = arith.constant 1.000000e+00 : f32
    %23 = vector.broadcast %cst_15 : f32 to vector<8x128xf32>
    %24 = arith.divf %23, %22 : vector<8x128xf32>
    %c0_16 = arith.constant 0 : index
    %c0_17 = arith.constant 0 : index
    %25 = vector.load %arg6[%c0_16, %c0_17] : memref<128x128xf32, #tpu.memory_space<vmem>>, vector<128x128xf32>
    %cst_18 = arith.constant dense<0.000000e+00> : vector<8x128xf32>
    %26 = tpu.matmul %24, %25, %cst_18 {dimension_numbers = #tpu.dot_dimension_numbers<[1], [0], [0], [1], [0, 0, 1, 1], [], []>} : vector<8x128xf32>, vector<128x128xf32>, vector<8x128xf32> -> vector<8x128xf32>
    %c0_19 = arith.constant 0 : index
    %c0_20 = arith.constant 0 : index
    %27 = vector.load %arg7[%c0_19, %c0_20] : memref<1x128xf32, #tpu.memory_space<vmem>>, vector<1x128xf32>
    %28 = vector.broadcast %27 : vector<1x128xf32> to vector<8x128xf32>
    %29 = arith.addf %26, %28 : vector<8x128xf32>
    %c0_21 = arith.constant 0 : index
    %c0_22 = arith.constant 0 : index
    %30 = vector.load %arg8[%c0_21, %c0_22] : memref<8x128xf32, #tpu.memory_space<vmem>>, vector<8x128xf32>
    tpu.vector_store %arg8[%c0_21, %c0_22], %29 {strides = array<i32>} : memref<8x128xf32, #tpu.memory_space<vmem>>, vector<8x128xf32>,
    return
  }
  func.func @transform_0(%arg0: i32) -> (i32, i32) {
    %c0_i32 = arith.constant 0 : i32
    %c0_i32_0 = arith.constant 0 : i32
    return %arg0, %c0_i32 : i32, i32
  }
  func.func @transform_1(%arg0: i32) -> (i32, i32) {
    %c0_i32 = arith.constant 0 : i32
    %c0_i32_0 = arith.constant 0 : i32
    %c0_i32_1 = arith.constant 0 : i32
    return %c0_i32, %c0_i32_0 : i32, i32
  }
  func.func @transform_2(%arg0: i32) -> (i32, i32) {
    %c0_i32 = arith.constant 0 : i32
    %c0_i32_0 = arith.constant 0 : i32
    %c0_i32_1 = arith.constant 0 : i32
    return %c0_i32, %c0_i32_0 : i32, i32
  }
  func.func @transform_3(%arg0: i32) -> (i32, i32) {
    %c0_i32 = arith.constant 0 : i32
    %c0_i32_0 = arith.constant 0 : i32
    %c0_i32_1 = arith.constant 0 : i32
    return %c0_i32, %c0_i32_0 : i32, i32
  }
  func.func @transform_4(%arg0: i32) -> (i32, i32) {
    %c0_i32 = arith.constant 0 : i32
    %c0_i32_0 = arith.constant 0 : i32
    %c0_i32_1 = arith.constant 0 : i32
    return %c0_i32, %c0_i32_0 : i32, i32
  }
  func.func @transform_5(%arg0: i32) -> (i32, i32) {
    %c0_i32 = arith.constant 0 : i32
    %c0_i32_0 = arith.constant 0 : i32
    %c0_i32_1 = arith.constant 0 : i32
    return %c0_i32, %c0_i32_0 : i32, i32
  }
  func.func @transform_6(%arg0: i32) -> (i32, i32) {
    %c0_i32 = arith.constant 0 : i32
    %c0_i32_0 = arith.constant 0 : i32
    %c0_i32_1 = arith.constant 0 : i32
    return %c0_i32, %c0_i32_0 : i32, i32
  }
  func.func @transform_7(%arg0: i32) -> (i32, i32) {
    %c0_i32 = arith.constant 0 : i32
    %c0_i32_0 = arith.constant 0 : i32
    return %arg0, %c0_i32 : i32, i32
  }
}

</mosaic_0001>

<bundles_post_ra>
// kernel: _lambda_.1
= control target key start
LH: loop header
LB: loop body
LE: loop exit
PB: predicated region body
PF: predicated region fallthrough
CT: control target
= control target key end

     0   :  { %12 = vsyncpa [#allocation3], 0  ;;  %s729_s0 = inlined_call_operand.vmem [shape: f32[8,128], index: 0, kind: input, shape index: {}]   ;;  %s730_s1 = inlined_call_operand.hbm [shape: f32[128,128], index: 1, kind: input, shape index: {}]   ;;  %s731_s2 = inlined_call_operand.vmem [shape: f32[1,128], index: 2, kind: input, shape index: {}]   ;;  %s732_s3 = inlined_call_operand.hbm [shape: f32[128,128], index: 3, kind: input, shape index: {}]   ;;  %s733_s4 = inlined_call_operand.vmem [shape: f32[1,128], index: 4, kind: input, shape index: {}]   ;;  %s734_s5 = inlined_call_operand.hbm [shape: f32[128,128], index: 5, kind: input, shape index: {}]   ;;  %s735_s6 = inlined_call_operand.vmem [shape: f32[1,128], index: 6, kind: input, shape index: {}]   ;;  %s736_s7 = inlined_call_operand.vmem [shape: f32[8,128], index: 7, kind: output, shape index: {}]  }
   0x1   :  { %13 = vsyncpa [#allocation5], 0  ;;  %s604_s24 = smov [#allocation4]   ;;  %s605_s26 = smov [#allocation2]  }
   0x2   :  { %s35_s25 = sshll.u32 %s604_s24, 4  ;;  %s21_s27 = sshll.u32 %s605_s26, 4  ;;  %s36_s25 = int_to_ptr.vmem [resolvable:$true] %s35_s25  ;;  %s22_s27 = int_to_ptr.vmem [resolvable:$true] %s21_s27 }
   0x3   :  { %s548_s28 = scalar_lea.vmem %s36_s25, 2048  ;;  %p553_p1 = scmp.lt.s32.totalorder %s36_s25, %s36_s25 }
   0x4   :  { %p549_p0 = scmp.ne.s32.totalorder %s36_s25, %s548_s28  ;;  %p554_p2 = scmp.lt.s32.totalorder %s548_s28, %s548_s28 }
   0x6   :  { %p555_p3 = por %p554_p2, %p553_p1 }
   0x8   :  { %p556_p4 = pnand %p555_p3, %p549_p0 }
   0xa   :  { %559 = shalt.err (!%p556_p4)
}
   0xb   :  { %s606_s29 = smov 128   ;;  %s607_s30 = smov 8  }
   0xc   :  { %41 = dma.hbm_to_vmem [thread:$0]  %s732_s3, 2048, %s36_s25, [#allocation5], %s606_s29, %s606_s29, %s607_s30  }
   0xd   :  { %s568_s10 = scalar_lea.vmem %s22_s27, 2048  ;;  %p573_p6 = scmp.lt.s32.totalorder %s22_s27, %s22_s27 }
   0xe   :  { %p569_p5 = scmp.ne.s32.totalorder %s22_s27, %s568_s10  ;;  %p574_p7 = scmp.lt.s32.totalorder %s568_s10, %s568_s10 }
  0x10   :  { %p575_p8 = por %p574_p7, %p573_p6 }
  0x12   :  { %p576_p9 = pnand %p575_p8, %p569_p5 }
  0x14   :  { %579 = shalt.err (!%p576_p9)
}
  0x15   :  { %27 = dma.hbm_to_vmem [thread:$0]  %s730_s1, 2048, %s22_s27, [#allocation3], %s606_s29, %s606_s29, %s607_s30  }
  0x16   :  { %s608_s13 = smov [#allocation6]  }
  0x17   :  { %s49_s14 = sshll.u32 %s608_s13, 4  ;;  %s50_s14 = int_to_ptr.vmem [resolvable:$true] %s49_s14 }
  0x18   :  { %s588_s15 = scalar_lea.vmem %s50_s14, 2048  ;;  %p593_p11 = scmp.lt.s32.totalorder %s50_s14, %s50_s14 }
  0x19   :  { %p589_p10 = scmp.ne.s32.totalorder %s50_s14, %s588_s15  ;;  %p594_p12 = scmp.lt.s32.totalorder %s588_s15, %s588_s15 }
  0x1b   :  { %p595_p13 = por %p594_p12, %p593_p11 }
  0x1d   :  { %p596_p0 = pnand %p595_p13, %p589_p10 }
  0x1f   :  { %599 = shalt.err (!%p596_p0)
}
  0x20   :  { %55 = dma.hbm_to_vmem [thread:$0]  %s734_s5, 2048, %s50_s14, [#allocation5], %s606_s29, %s606_s29, %s607_s30  }
  0x21   :  { %600 = dma.done.wait [#allocation3], 2048  }
  0x22   :  { %601 = vsyncadd [#allocation3], 4294965248 }
  0x23   :  { %602 = dma.done.wait [#allocation5], 4096  }
  0x24   :  { %603 = vsyncadd [#allocation5], 4294963200  ;;  %v609_v0 = vmov 0.0   ;;  %vm610_vm0 = vmmov 0   ;;  %v83_v1 = vld [vmem:[#allocation2 + $0x78] sm:$0xff]  ;;  %v82_v2 = vld [vmem:[#allocation2 + $0x70] sm:$0xff] }
  0x25   :  { %420 = vmatprep.subr.mxu0 %v609_v0  ;;  %452 = vmatprep.mubr.msk.f32.mxu0 %vm610_vm0, %v609_v0  ;;  %v81_v3 = vld [vmem:[#allocation2 + $0x68] sm:$0xff]  ;;  %v80_v4 = vld [vmem:[#allocation2 + $0x60] sm:$0xff]  ;;  %v79_v5 = vld [vmem:[#allocation2 + $0x58] sm:$0xff] }
  0x26   :  { %455 = vmatprep.subr.mxu1 %v609_v0  ;;  %487 = vmatprep.mubr.msk.f32.mxu1 %vm610_vm0, %v609_v0  ;;  %v78_v6 = vld [vmem:[#allocation2 + $0x50] sm:$0xff]  ;;  %v77_v7 = vld [vmem:[#allocation2 + $0x48] sm:$0xff]  ;;  %v76_v8 = vld [vmem:[#allocation2 + $0x40] sm:$0xff] }
  0x27   :  { %421 = vmatpush3.msra.mxu0 %v83_v1  ;;  %v75_v9 = vld [vmem:[#allocation2 + $0x38] sm:$0xff]  ;;  %v74_v10 = vld [vmem:[#allocation2 + $0x30] sm:$0xff]  ;;  %v73_v11 = vld [vmem:[#allocation2 + $0x28] sm:$0xff] }
  0x28   :  { %422 = vmatprep.subr.mxu0 %v609_v0  ;;  %v72_v12 = vld [vmem:[#allocation2 + $0x20] sm:$0xff]  ;;  %v71_v13 = vld [vmem:[#allocation2 + $0x18] sm:$0xff]  ;;  %v70_v14 = vld [vmem:[#allocation2 + $0x10] sm:$0xff] }
  0x29   :  { %423 = vmatpush3.msra.mxu0 %v82_v2  ;;  %v69_v15 = vld [vmem:[#allocation2 + $0x8] sm:$0xff]  ;;  %v68_v16 = vld [vmem:[#allocation2] sm:$0xff]  ;;  %v182_v18 = vld [vmem:[#allocation4 + $0x78] sm:$0xff] }
  0x2a   :  { %424 = vmatprep.subr.mxu0 %v609_v0  ;;  %v67_v17 = vld [vmem:[%s729_s0] sm:$0xff]  ;;  %456 = vmatpush3.msra.mxu1 %v182_v18  ;;  %v181_v19 = vld [vmem:[#allocation4 + $0x70] sm:$0xff]  ;;  %v180_v20 = vld [vmem:[#allocation4 + $0x68] sm:$0xff] }
  0x2b   :  { %425 = vmatpush3.msra.mxu0 %v81_v3  ;;  %457 = vmatprep.subr.mxu1 %v609_v0  ;;  %v179_v21 = vld [vmem:[#allocation4 + $0x60] sm:$0xff]  ;;  %v178_v22 = vld [vmem:[#allocation4 + $0x58] sm:$0xff]  ;;  %v177_v23 = vld [vmem:[#allocation4 + $0x50] sm:$0xff] }
  0x2c   :  { %426 = vmatprep.subr.mxu0 %v609_v0  ;;  %458 = vmatpush3.msra.mxu1 %v181_v19  ;;  %v176_v24 = vld [vmem:[#allocation4 + $0x48] sm:$0xff]  ;;  %v175_v25 = vld [vmem:[#allocation4 + $0x40] sm:$0xff]  ;;  %v174_v26 = vld [vmem:[#allocation4 + $0x38] sm:$0xff] }
  0x2d   :  { %427 = vmatpush3.msra.mxu0 %v80_v4  ;;  %459 = vmatprep.subr.mxu1 %v609_v0  ;;  %v173_v27 = vld [vmem:[#allocation4 + $0x30] sm:$0xff]  ;;  %v172_v28 = vld [vmem:[#allocation4 + $0x28] sm:$0xff]  ;;  %v171_v29 = vld [vmem:[#allocation4 + $0x20] sm:$0xff] }
  0x2e   :  { %428 = vmatprep.subr.mxu0 %v609_v0  ;;  %460 = vmatpush3.msra.mxu1 %v180_v20  ;;  %v170_v30 = vld [vmem:[#allocation4 + $0x18] sm:$0xff]  ;;  %v169_v31 = vld [vmem:[#allocation4 + $0x10] sm:$0xff]  ;;  %v168_v32 = vld [vmem:[#allocation4 + $0x8] sm:$0xff] }
  0x2f   :  { %429 = vmatpush3.msra.mxu0 %v79_v5  ;;  %461 = vmatprep.subr.mxu1 %v609_v0  ;;  %v167_v33 = vld [vmem:[#allocation4] sm:$0xff]  ;;  %v281_v43 = vld [vmem:[#allocation6 + $0x78] sm:$0xff]  ;;  %v280_v44 = vld [vmem:[#allocation6 + $0x70] sm:$0xff] }
  0x30   :  { %430 = vmatprep.subr.mxu0 %v609_v0  ;;  %462 = vmatpush3.msra.mxu1 %v179_v21  ;;  %v366_v34 = vld [vmem:[%s731_s2] ss:$0 sm:$0xff]  ;;  %v279_v45 = vld [vmem:[#allocation6 + $0x68] sm:$0xff]  ;;  %v277_v47 = vld [vmem:[#allocation6 + $0x58] sm:$0xff] }
  0x31   :  { %431 = vmatpush3.msra.mxu0 %v78_v6  ;;  %463 = vmatprep.subr.mxu1 %v609_v0  ;;  %v278_v46 = vld [vmem:[#allocation6 + $0x60] sm:$0xff]  ;;  %v276_v48 = vld [vmem:[#allocation6 + $0x50] sm:$0xff]  ;;  %v275_v49 = vld [vmem:[#allocation6 + $0x48] sm:$0xff] }
  0x32   :  { %432 = vmatprep.subr.mxu0 %v609_v0  ;;  %464 = vmatpush3.msra.mxu1 %v178_v22  ;;  %v274_v50 = vld [vmem:[#allocation6 + $0x40] sm:$0xff]  ;;  %v273_v51 = vld [vmem:[#allocation6 + $0x38] sm:$0xff]  ;;  %v272_v52 = vld [vmem:[#allocation6 + $0x30] sm:$0xff] }
  0x33   :  { %433 = vmatpush3.msra.mxu0 %v77_v7  ;;  %465 = vmatprep.subr.mxu1 %v609_v0  ;;  %v271_v53 = vld [vmem:[#allocation6 + $0x28] sm:$0xff]  ;;  %v270_v54 = vld [vmem:[#allocation6 + $0x20] sm:$0xff]  ;;  %v269_v55 = vld [vmem:[#allocation6 + $0x18] sm:$0xff] }
  0x34   :  { %434 = vmatprep.subr.mxu0 %v609_v0  ;;  %466 = vmatpush3.msra.mxu1 %v177_v23  ;;  %v268_v56 = vld [vmem:[#allocation6 + $0x10] sm:$0xff]  ;;  %v267_v57 = vld [vmem:[#allocation6 + $0x8] sm:$0xff]  ;;  %v266_v58 = vld [vmem:[#allocation6] sm:$0xff] }
  0x35   :  { %435 = vmatpush3.msra.mxu0 %v76_v8  ;;  %467 = vmatprep.subr.mxu1 %v609_v0  ;;  %v367_v59 = vld [vmem:[%s733_s4] ss:$0 sm:$0xff] }
  0x36   :  { %436 = vmatprep.subr.mxu0 %v609_v0  ;;  %468 = vmatpush3.msra.mxu1 %v176_v24 }
  0x37   :  { %437 = vmatpush3.msra.mxu0 %v75_v9  ;;  %469 = vmatprep.subr.mxu1 %v609_v0 }
  0x38   :  { %438 = vmatprep.subr.mxu0 %v609_v0  ;;  %470 = vmatpush3.msra.mxu1 %v175_v25 }
  0x39   :  { %439 = vmatpush3.msra.mxu0 %v74_v10  ;;  %471 = vmatprep.subr.mxu1 %v609_v0 }
  0x3a   :  { %440 = vmatprep.subr.mxu0 %v609_v0  ;;  %472 = vmatpush3.msra.mxu1 %v174_v26 }
  0x3b   :  { %441 = vmatpush3.msra.mxu0 %v73_v11  ;;  %473 = vmatprep.subr.mxu1 %v609_v0 }
  0x3c   :  { %442 = vmatprep.subr.mxu0 %v609_v0  ;;  %474 = vmatpush3.msra.mxu1 %v173_v27 }
  0x3d   :  { %443 = vmatpush3.msra.mxu0 %v72_v12  ;;  %475 = vmatprep.subr.mxu1 %v609_v0 }
  0x3e   :  { %444 = vmatprep.subr.mxu0 %v609_v0  ;;  %476 = vmatpush3.msra.mxu1 %v172_v28 }
  0x3f   :  { %445 = vmatpush3.msra.mxu0 %v71_v13  ;;  %477 = vmatprep.subr.mxu1 %v609_v0 }
  0x40   :  { %446 = vmatprep.subr.mxu0 %v609_v0  ;;  %478 = vmatpush3.msra.mxu1 %v171_v29 }
  0x41   :  { %447 = vmatpush3.msra.mxu0 %v70_v14  ;;  %479 = vmatprep.subr.mxu1 %v609_v0 }
  0x42   :  { %448 = vmatprep.subr.mxu0 %v609_v0  ;;  %480 = vmatpush3.msra.mxu1 %v170_v30 }
  0x43   :  { %449 = vmatpush3.msra.mxu0 %v69_v15  ;;  %481 = vmatprep.subr.mxu1 %v609_v0 }
  0x44   :  { %450 = vmatprep.subr.mxu0 %v609_v0  ;;  %482 = vmatpush3.msra.mxu1 %v169_v31 }
  0x45   :  { %451 = vmatpush3.msra.mxu0 %v68_v16  ;;  %483 = vmatprep.subr.mxu1 %v609_v0 }
  0x46   :  { %453 = vmatmul.mubr.f32.vlgmr.msra.gmra.mxu0 %v67_v17  ;;  %490 = vmatprep.subr.mxu0 %v609_v0 }
  0x47   :  { %522 = vmatprep.mubr.msk.f32.mxu0 %vm610_vm0, %v609_v0  ;;  %484 = vmatpush3.msra.mxu1 %v168_v32 }
  0x48   :  { %485 = vmatprep.subr.mxu1 %v609_v0  ;;  %491 = vmatpush3.msra.mxu0 %v281_v43 }
  0x49   :  { %486 = vmatpush3.msra.mxu1 %v167_v33  ;;  %492 = vmatprep.subr.mxu0 %v609_v0 }
  0x4a   :  { %493 = vmatpush3.msra.mxu0 %v280_v44 }
  0x4b   :  { %494 = vmatprep.subr.mxu0 %v609_v0 }
  0x4c   :  { %495 = vmatpush3.msra.mxu0 %v279_v45 }
  0x4d   :  { %496 = vmatprep.subr.mxu0 %v609_v0 }
  0x4e   :  { %497 = vmatpush3.msra.mxu0 %v278_v46 }
  0x4f   :  { %498 = vmatprep.subr.mxu0 %v609_v0 }
  0x50   :  { %499 = vmatpush3.msra.mxu0 %v277_v47 }
  0x51   :  { %500 = vmatprep.subr.mxu0 %v609_v0 }
  0x52   :  { %501 = vmatpush3.msra.mxu0 %v276_v48 }
  0x53   :  { %502 = vmatprep.subr.mxu0 %v609_v0 }
  0x54   :  { %503 = vmatpush3.msra.mxu0 %v275_v49 }
  0x55   :  { %504 = vmatprep.subr.mxu0 %v609_v0 }
  0x56   :  { %505 = vmatpush3.msra.mxu0 %v274_v50 }
  0x57   :  { %506 = vmatprep.subr.mxu0 %v609_v0 }
  0x58   :  { %507 = vmatpush3.msra.mxu0 %v273_v51 }
  0x59   :  { %508 = vmatprep.subr.mxu0 %v609_v0 }
  0x5a   :  { %509 = vmatpush3.msra.mxu0 %v272_v52 }
  0x5b   :  { %510 = vmatprep.subr.mxu0 %v609_v0 }
  0x5c   :  { %511 = vmatpush3.msra.mxu0 %v271_v53 }
  0x5d   :  { %512 = vmatprep.subr.mxu0 %v609_v0 }
  0x5e   :  { %513 = vmatpush3.msra.mxu0 %v270_v54 }
  0x5f   :  { %514 = vmatprep.subr.mxu0 %v609_v0 }
  0x60   :  { %515 = vmatpush3.msra.mxu0 %v269_v55 }
  0x61   :  { %516 = vmatprep.subr.mxu0 %v609_v0 }
  0x62   :  { %517 = vmatpush3.msra.mxu0 %v268_v56 }
  0x63   :  { %518 = vmatprep.subr.mxu0 %v609_v0 }
  0x64   :  { %519 = vmatpush3.msra.mxu0 %v267_v57 }
  0x65   :  { %520 = vmatprep.subr.mxu0 %v609_v0  ;;  %v368_v0 = vld [vmem:[%s735_s6] ss:$0 sm:$0xff] }
  0x66   :  { %521 = vmatpush3.msra.mxu0 %v266_v58 }
 0x106   :  { %v157_v35 = vpop.f32.mrf.mxu0 }
 0x107   :  { %v158_v36 = vadd.f32 %v366_v34, %v157_v35 }
 0x108   :  { %v454_v37 = vpop.f32.mrf.mxu0 }
 0x109   :  { %v161_v38 = vsub.f32 0.0, %v158_v36 }
 0x10b   :  { %v162_v39 = vmul.f32 1.442695, %v161_v38 }
 0x10d   :  { %532 = vpow2.f32 %v162_v39 }
 0x11a   :  { %v533_v40 = vpop.eup %532 }
 0x11b   :  { %v164_v41 = vadd.f32 1.0, %v533_v40 }
 0x11d   :  { %534 = vrcp.f32 %v164_v41 }
 0x12a   :  { %v535_v42 = vpop.eup %534 }
 0x12b   :  { %488 = vmatmul.mubr.f32.vlgmr.msra.gmra.mxu1 %v535_v42 }
 0x1eb   :  { %v256_v60 = vpop.f32.mrf.mxu1 }
 0x1ec   :  { %v257_v61 = vadd.f32 %v367_v59, %v256_v60 }
 0x1ed   :  { %v489_v62 = vpop.f32.mrf.mxu1 }
 0x1ee   :  { %v260_v63 = vsub.f32 0.0, %v257_v61 }
 0x1f0   :  { %v261_v1 = vmul.f32 1.442695, %v260_v63 }
 0x1f2   :  { %536 = vpow2.f32 %v261_v1 }
 0x1ff   :  { %v537_v2 = vpop.eup %536 }
 0x200   :  { %v263_v3 = vadd.f32 1.0, %v537_v2 }
 0x202   :  { %538 = vrcp.f32 %v263_v3 }
 0x20f   :  { %v539_v4 = vpop.eup %538 }
 0x210   :  { %523 = vmatmul.mubr.f32.vlgmr.msra.gmra.mxu0 %v539_v4 }
 0x2d0   :  { %v355_v5 = vpop.f32.mrf.mxu0 }
 0x2d1   :  { %v356_v6 = vadd.f32 %v368_v0, %v355_v5 }
 0x2d2   :  { %v524_v7 = vpop.f32.mrf.mxu0 }
 0x2d3   :  { %359 = vst [vmem:[%s736_s7] sm:$0xff] %v356_v6 }
 0x2d4   :  { %364 = vsyncpa [#allocation3], 1 }
 0x2d5   :  { %365 = vsyncpa [#allocation5], 1 }

</bundles_post_ra>
